<compile_context>
chip_gen: v7x
topology: tpu7x:2x2x1
jax: 0.10.0
libtpu: 0.0.40
codegen_flags: <defaults>
</compile_context>

<pallas_src>
import math

import jax
import jax.numpy as jnp
from jax.experimental import pallas as pl
from jax.experimental.pallas import tpu as pltpu


def _round_up(x, m):
    return ((x + m - 1) // m) * m


def _sublane_min(dtype):
    # Minimum legal/packed second-to-last tile dim per dtype (f32:8, bf16:16, int8/fp8:32).
    return {4: 8, 2: 16, 1: 32}.get(jnp.dtype(dtype).itemsize, 8)


def _lane_align(n):
    # Prefer 256-aligned tiles (full 256x256 MXU passes on v6e/v7x) when the
    # extra padding over 128-alignment is small; otherwise 128 (v5e MXU width
    # and the minimum lane tile) to avoid wasted FLOPs/HBM bytes.
    a128 = _round_up(n, 128)
    a256 = _round_up(n, 256)
    return a256 if a256 * 8 <= a128 * 9 else a128


def _vmem_capacity_bytes():
    try:
        return int(pltpu.get_tpu_info().vmem_capacity_bytes)
    except Exception:
        return 64 * 1024 * 1024  # conservative fallback (v7x per-core VMEM)


def _linear_kernel_f32_out(x_ref, w_ref, b_ref, o_ref):
    # f32 output: the output tile's block index ignores k, so it stays
    # VMEM-resident across the K loop and doubles as the accumulator
    # (no scratch, no extra VMEM->VMEM copy).
    @pl.when(pl.program_id(2) == 0)
    def _init():
        # Bias added exactly once, as the accumulator's initial value.
        o_ref[...] = jnp.broadcast_to(b_ref[...].astype(jnp.float32), o_ref.shape)

    # MXU matmul with f32 accumulation. NOTE: default precision => f32 inputs
    # take the MXU's decomposed path (close to, but not bitwise, HIGHEST).
    o_ref[...] += jnp.dot(
        x_ref[...], w_ref[...], preferred_element_type=jnp.float32
    )


def _linear_kernel_cast_out(x_ref, w_ref, b_ref, o_ref, acc_ref):
    # Non-f32 output: accumulate in an f32 VMEM scratch, cast + store on the
    # last K step.
    k = pl.program_id(2)

    @pl.when(k == 0)
    def _init():
        acc_ref[...] = jnp.zeros_like(acc_ref)

    acc_ref[...] += jnp.dot(
        x_ref[...], w_ref[...], preferred_element_type=jnp.float32
    )

    @pl.when(k == pl.num_programs(2) - 1)
    def _finalize():
        out = acc_ref[...] + b_ref[...].astype(jnp.float32)
        o_ref[...] = out.astype(o_ref.dtype)


def linear_pallas(x, w, b, *, tm=None, tn=None, tk=None, out_dtype=None):
    M, K = x.shape
    K2, N = w.shape
    assert K == K2 and b.shape == (N,)
    out_dtype = jnp.dtype(out_dtype if out_dtype is not None else x.dtype)

    in_bytes = max(jnp.dtype(x.dtype).itemsize, jnp.dtype(w.dtype).itemsize)
    out_bytes = out_dtype.itemsize
    f32_out = out_dtype == jnp.dtype(jnp.float32)
    sub = max(_sublane_min(x.dtype), _sublane_min(out_dtype))

    # ---- Generation-aware VMEM budget ----
    vmem_cap = _vmem_capacity_bytes()          # 128 MiB (v5e/v6e) / 64 MiB (v7x)
    vmem_limit = (vmem_cap * 3) // 4           # scoped-VMEM cap handed to Mosaic
    tile_budget = vmem_limit - (4 << 20)       # headroom for compiler internal scratch

    # ---- Default tile sizes ----
    if M <= 256:
        # Small-M (inference-style) fast path: one row-tile for the whole batch,
        # wide lane-dense N/K tiles -> big DMAs + unmasked stores (mem-bound regime).
        dtm, dtn, dtk = _round_up(M, sub), 1024, 1024
    else:
        dtm, dtn, dtk = 512, 512, 512
    tm = tm if tm is not None else dtm
    tn = tn if tn is not None else dtn
    tk = tk if tk is not None else dtk

    # Clamp to the (padded) problem with layout-legal alignment.
    tm = min(tm, _round_up(M, sub))
    tn = min(tn, _lane_align(N))
    tk = min(tk, _lane_align(K))

    # Shrink tiles until the double-buffered footprint fits the VMEM budget
    # (matters on v7x's 64 MiB; shrink K first -> no extra HBM re-reads).
    def _footprint(tm_, tn_, tk_):
        f = 2 * (tm_ * tk_ + tk_ * tn_) * in_bytes   # x/w tiles, double-buffered
        f += 2 * tm_ * tn_ * out_bytes               # output tile
        f += 2 * tn_ * 4                             # bias tile (tiny)
        if not f32_out:
            f += tm_ * tn_ * 4                       # f32 scratch accumulator
        return f

    while _footprint(tm, tn, tk) > tile_budget:
        if tk > 128:
            tk = _round_up(max(128, tk // 2), 128)
        elif tn > 128:
            tn = _round_up(max(128, tn // 2), 128)
        elif tm > sub:
            tm = _round_up(max(sub, tm // 2), sub)
        else:
            break

    # Ensure >= 2 parallel (i, j) tiles when it is free: v7x has 2 TensorCores
    # and shards the parallel grid axes across them.
    if (_round_up(M, tm) // tm) * (_round_up(N, tn) // tn) == 1:
        if tn >= 256 and tn % 256 == 0:
            tn //= 2
        elif tm >= 2 * sub and (tm // 2) % sub == 0:
            tm //= 2

    Mp, Kp, Np = _round_up(M, tm), _round_up(K, tk), _round_up(N, tn)

    # Zero-pad only when the logical shapes are not already tile-aligned
    # (padded K rows/cols contribute 0; result is sliced back out).
    # TODO(synk): for a real nn.Linear, pad w/b once at init, not per call.
    xp = x if (Mp, Kp) == (M, K) else jnp.pad(x, ((0, Mp - M), (0, Kp - K)))
    wp = w if (Kp, Np) == (K, N) else jnp.pad(w, ((0, Kp - K), (0, Np - N)))
    bp = (b if Np == N else jnp.pad(b, (0, Np - N))).reshape(1, Np)

    grid = (Mp // tm, Np // tn, Kp // tk)

    cost = pl.CostEstimate(
        flops=2 * Mp * Np * Kp,
        transcendentals=0,
        bytes_accessed=(
            Mp * Kp * jnp.dtype(x.dtype).itemsize
            + Kp * Np * jnp.dtype(w.dtype).itemsize
            + Np * jnp.dtype(b.dtype).itemsize
            + Mp * Np * out_bytes
        ),
    )

    in_specs = [
        pl.BlockSpec((tm, tk), lambda i, j, k: (i, k)),   # x tile
        pl.BlockSpec((tk, tn), lambda i, j, k: (k, j)),   # w tile
        pl.BlockSpec((1, tn), lambda i, j, k: (0, j)),    # bias tile (per j)
    ]
    out_spec = pl.BlockSpec((tm, tn), lambda i, j, k: (i, j))

    if f32_out:
        kernel, scratch = _linear_kernel_f32_out, []
    else:
        kernel, scratch = _linear_kernel_cast_out, [pltpu.VMEM((tm, tn), jnp.float32)]

    out_padded = pl.pallas_call(
        kernel,
        out_shape=jax.ShapeDtypeStruct((Mp, Np), out_dtype),
        grid_spec=pltpu.PrefetchScalarGridSpec(
            num_scalar_prefetch=0,
            grid=grid,
            in_specs=in_specs,
            out_specs=out_spec,
            scratch_shapes=scratch,
        ),
        compiler_params=pltpu.CompilerParams(
            dimension_semantics=("parallel", "parallel", "arbitrary"),
            vmem_limit_bytes=vmem_limit,
        ),
        cost_estimate=cost,
    )(xp, wp, bp)

    if (Mp, Np) == (M, N):
        return out_padded
    return out_padded[:M, :N]


def xavier_uniform(key, shape, dtype=jnp.float32):
    # Matches torch.nn.init.xavier_uniform_ for a (fan_in, fan_out) matrix.
    fan_in, fan_out = shape
    limit = math.sqrt(6.0 / (fan_in + fan_out))
    return jax.random.uniform(key, shape, dtype, minval=-limit, maxval=limit)


if __name__ == "__main__":
    key = jax.random.PRNGKey(0)

    # --- Small demo at the module's natural shapes (batch=8, 32 -> 16) ---
    input_dim, output_dim, batch = 32, 16, 8
    k_w, k_x, k2 = jax.random.split(key, 3)

    w = xavier_uniform(k_w, (input_dim, output_dim))
    b = jnp.zeros((output_dim,), dtype=jnp.float32)
    x = jax.random.normal(k_x, (batch, input_dim), dtype=jnp.float32)

    out = linear_pallas(x, w, b)
    jax.block_until_ready(out)

    ref = x @ w + b
    assert out.shape == (batch, output_dim)
    assert jnp.allclose(out, ref, atol=1e-5, rtol=1e-5)

    # --- Larger shapes to exercise the tiled (i, j, k) grid path ---
    M2, K2, N2 = 384, 512, 384
    k_w2, k_x2 = jax.random.split(k2)
    w2 = xavier_uniform(k_w2, (K2, N2))
    b2 = jnp.linspace(-1.0, 1.0, N2, dtype=jnp.float32)
    x2 = jax.random.normal(k_x2, (M2, K2), dtype=jnp.float32)

    out2 = linear_pallas(x2, w2, b2)
    jax.block_until_ready(out2)

    ref2 = jnp.dot(x2, w2, precision=jax.lax.Precision.HIGHEST) + b2
    assert out2.shape == (M2, N2)
    assert jnp.allclose(out2, ref2, atol=1e-3, rtol=1e-3)

    print("KERNEL_OK")
</pallas_src>

<mosaic_0001>
module attributes {stable_mosaic.version = 11 : i64} {
  func.func @_linear_kernel_f32_out(%arg0: i32, %arg1: i32, %arg2: i32, %arg3: memref<8x128xf32, #tpu.memory_space<vmem>>, %arg4: memref<128x128xf32, #tpu.memory_space<vmem>>, %arg5: memref<1x128xf32, #tpu.memory_space<vmem>>, %arg6: memref<8x128xf32, #tpu.memory_space<vmem>>) attributes {dimension_semantics = [#tpu.dimension_semantics<parallel>, #tpu.dimension_semantics<parallel>, #tpu.dimension_semantics<arbitrary>], iteration_bounds = array<i64: 1, 1, 1>, scalar_prefetch = 0 : i64, scratch_operands = 0 : i64, tpu.core_type = #tpu.core_type<tc>, window_params = [{transform_indices = @transform_0, window_bounds = array<i64: 8, 128>}, {transform_indices = @transform_1, window_bounds = array<i64: 128, 128>}, {transform_indices = @transform_2, window_bounds = array<i64: 1, 128>}, {transform_indices = @transform_3, window_bounds = array<i64: 8, 128>}]} {
    %c0_i32 = arith.constant 0 : i32
    %0 = arith.cmpi eq, %arg2, %c0_i32 : i32
    %1 = arith.extui %0 : i1 to i32
    %c0_i32_0 = arith.constant 0 : i32
    %2 = arith.cmpi ne, %1, %c0_i32_0 : i32
    scf.if %2 {
      %c0_8 = arith.constant 0 : index
      %c0_9 = arith.constant 0 : index
      %9 = vector.load %arg5[%c0_8, %c0_9] : memref<1x128xf32, #tpu.memory_space<vmem>>, vector<1x128xf32>
      %10 = vector.shape_cast %9 : vector<1x128xf32> to vector<1x128xf32>
      %11 = vector.broadcast %10 : vector<1x128xf32> to vector<8x128xf32>
      %c0_10 = arith.constant 0 : index
      %c0_11 = arith.constant 0 : index
      %12 = vector.load %arg6[%c0_10, %c0_11] : memref<8x128xf32, #tpu.memory_space<vmem>>, vector<8x128xf32>
      tpu.vector_store %arg6[%c0_10, %c0_11], %11 {strides = array<i32>} : memref<8x128xf32, #tpu.memory_space<vmem>>, vector<8x128xf32>,
    } else {
    }
    %c0 = arith.constant 0 : index
    %c0_1 = arith.constant 0 : index
    %3 = vector.load %arg6[%c0, %c0_1] : memref<8x128xf32, #tpu.memory_space<vmem>>, vector<8x128xf32>
    %c0_2 = arith.constant 0 : index
    %c0_3 = arith.constant 0 : index
    %4 = vector.load %arg3[%c0_2, %c0_3] : memref<8x128xf32, #tpu.memory_space<vmem>>, vector<8x128xf32>
    %c0_4 = arith.constant 0 : index
    %c0_5 = arith.constant 0 : index
    %5 = vector.load %arg4[%c0_4, %c0_5] : memref<128x128xf32, #tpu.memory_space<vmem>>, vector<128x128xf32>
    %cst = arith.constant dense<0.000000e+00> : vector<8x128xf32>
    %6 = tpu.matmul %4, %5, %cst {dimension_numbers = #tpu.dot_dimension_numbers<[1], [0], [0], [1], [0, 0, 1, 1], [], []>} : vector<8x128xf32>, vector<128x128xf32>, vector<8x128xf32> -> vector<8x128xf32>
    %7 = arith.addf %3, %6 : vector<8x128xf32>
    %c0_6 = arith.constant 0 : index
    %c0_7 = arith.constant 0 : index
    %8 = vector.load %arg6[%c0_6, %c0_7] : memref<8x128xf32, #tpu.memory_space<vmem>>, vector<8x128xf32>
    tpu.vector_store %arg6[%c0_6, %c0_7], %7 {strides = array<i32>} : memref<8x128xf32, #tpu.memory_space<vmem>>, vector<8x128xf32>,
    return
  }
  func.func @transform_0(%arg0: i32, %arg1: i32, %arg2: i32) -> (i32, i32) {
    %c0_i32 = arith.constant 0 : i32
    return %arg0, %arg2 : i32, i32
  }
  func.func @transform_1(%arg0: i32, %arg1: i32, %arg2: i32) -> (i32, i32) {
    %c0_i32 = arith.constant 0 : i32
    return %arg2, %arg1 : i32, i32
  }
  func.func @transform_2(%arg0: i32, %arg1: i32, %arg2: i32) -> (i32, i32) {
    %c0_i32 = arith.constant 0 : i32
    %c0_i32_0 = arith.constant 0 : i32
    return %c0_i32, %arg1 : i32, i32
  }
  func.func @transform_3(%arg0: i32, %arg1: i32, %arg2: i32) -> (i32, i32) {
    %c0_i32 = arith.constant 0 : i32
    return %arg0, %arg1 : i32, i32
  }
}

</mosaic_0001>

<bundles_post_ra>
// kernel: tpu_custom_call.1
= control target key start
LH: loop header
LB: loop body
LE: loop exit
PB: predicated region body
PF: predicated region fallthrough
CT: control target
= control target key end

     0   :  { %8 = vsyncpa [#allocation3], 0  ;;  %s390_s0 = inlined_call_operand.hbm [shape: f32[8,128], index: 0, kind: input, shape index: {}]   ;;  %s391_s1 = inlined_call_operand.hbm [shape: f32[128,128], index: 1, kind: input, shape index: {}]   ;;  %s392_s2 = inlined_call_operand.vmem [shape: f32[1,128], index: 2, kind: input, shape index: {}]   ;;  %s393_s3 = inlined_call_operand.hbm [shape: f32[8,128], index: 3, kind: output, shape index: {}]  }
   0x1   :  { %9 = vsyncpa [#allocation6], 0 }
   0x2   :  { %10 = vsyncpa [#allocation4], 0  ;;  %s316_s12 = smov [#allocation2]   ;;  %s317_s14 = smov [#allocation5]  }
   0x3   :  { %s17_s13 = sshll.u32 %s316_s12, 4  ;;  %s26_s15 = sshll.u32 %s317_s14, 4  ;;  %s18_s13 = int_to_ptr.vmem [resolvable:$true] %s17_s13  ;;  %s344_s15 = int_to_ptr.vmem [resolvable:$true] %s26_s15 }
   0x4   :  { %s244_s18 = scalar_lea.hbm %s390_s0, 128 }
   0x5   :  { %p245_p0 = scmp.ne.s32.totalorder %s390_s0, %s244_s18  ;;  %p248_p1 = scmp.lt.u32.totalorder %s244_s18, %s390_s0 }
   0x7   :  { %p250_p2 = pnand %p248_p1, %p245_p0 }
   0x9   :  { %253 = shalt.err (!%p250_p2)
}
   0xa   :  { %s254_s23 = scalar_lea.vmem %s18_s13, 128  ;;  %p259_p4 = scmp.lt.s32.totalorder %s18_s13, %s18_s13 }
   0xb   :  { %p255_p3 = scmp.ne.s32.totalorder %s18_s13, %s254_s23  ;;  %p260_p5 = scmp.lt.s32.totalorder %s254_s23, %s254_s23 }
   0xd   :  { %p261_p6 = por %p260_p5, %p259_p4 }
   0xf   :  { %p262_p7 = pnand %p261_p6, %p255_p3 }
  0x11   :  { %265 = shalt.err (!%p262_p7)
}
  0x12   :  { %20 = dma.hbm_to_vmem [thread:$0]  %s390_s0, 128, %s18_s13, [#allocation3]  }
  0x13   :  { %s266_s28 = scalar_lea.hbm %s391_s1, 2048 }
  0x14   :  { %p267_p8 = scmp.ne.s32.totalorder %s391_s1, %s266_s28  ;;  %p270_p9 = scmp.lt.u32.totalorder %s266_s28, %s391_s1 }
  0x16   :  { %p272_p10 = pnand %p270_p9, %p267_p8 }
  0x18   :  { %275 = shalt.err (!%p272_p10)
}
  0x19   :  { %s276_s6 = scalar_lea.vmem %s344_s15, 2048  ;;  %p281_p12 = scmp.lt.s32.totalorder %s344_s15, %s344_s15 }
  0x1a   :  { %p277_p11 = scmp.ne.s32.totalorder %s344_s15, %s276_s6  ;;  %p282_p13 = scmp.lt.s32.totalorder %s276_s6, %s276_s6 }
  0x1c   :  { %p283_p0 = por %p282_p13, %p281_p12 }
  0x1e   :  { %p284_p1 = pnand %p283_p0, %p277_p11 }
  0x20   :  { %287 = shalt.err (!%p284_p1)
}
  0x21   :  { %s318_s0 = smov 128   ;;  %s319_s7 = smov 8  }
  0x22   :  { %32 = dma.hbm_to_vmem [thread:$0]  %s391_s1, 2048, %s344_s15, [#allocation6], %s318_s0, %s318_s0, %s319_s7  }
  0x23   :  { %310 = dma.done.wait [#allocation3], 128  }
  0x24   :  { %311 = vsyncadd [#allocation3], 4294967168 }
  0x25   :  { %312 = dma.done.wait [#allocation6], 2048  }
  0x26   :  { %313 = vsyncadd [#allocation6], 4294965248  ;;  %v320_v0 = vmov 0.0|0.0   ;;  %vm321_vm0 = vmmov 0   ;;  %v322_v1 = vmov 0.0   ;;  %v55_v2 = vld [vmem:[#allocation5] sm:$0xff] }
  0x27   :  { %212 = vmatprep.subr.bf16.mxu0 %v320_v0  ;;  %209 = vmatprep.mubr.msk.f32.mxu0 %vm321_vm0, %v322_v1  ;;  %v56_v3 = vld [vmem:[#allocation5 + $0x8] sm:$0xff]  ;;  %v57_v4 = vld [vmem:[#allocation5 + $0x10] sm:$0xff]  ;;  %v58_v6 = vld [vmem:[#allocation5 + $0x18] sm:$0xff]  ;;  %s323_s11 = smov [#allocation7]  }
  0x28   :  { %v213_v5 = vpack.c.bf16 %v56_v3, %v55_v2  ;;  %v216_v7 = vpack.c.bf16 %v58_v6, %v57_v4  ;;  %v59_v8 = vld [vmem:[#allocation5 + $0x20] sm:$0xff]  ;;  %v60_v9 = vld [vmem:[#allocation5 + $0x28] sm:$0xff]  ;;  %v61_v11 = vld [vmem:[#allocation5 + $0x30] sm:$0xff]  ;;  %s149_s12 = sshll.u32 %s323_s11, 4  ;;  %s150_s12 = int_to_ptr.vmem [resolvable:$true] %s149_s12 }
  0x29   :  { %v219_v10 = vpack.c.bf16 %v60_v9, %v59_v8  ;;  %v62_v12 = vld [vmem:[#allocation5 + $0x38] sm:$0xff]  ;;  %v63_v14 = vld [vmem:[#allocation5 + $0x40] sm:$0xff]  ;;  %v64_v15 = vld [vmem:[#allocation5 + $0x48] sm:$0xff]  ;;  %s288_s13 = scalar_lea.vmem %s150_s12, 128  ;;  %p293_p3 = scmp.lt.s32.totalorder %s150_s12, %s150_s12 }
  0x2a   :  { %214 = vmatpush3.bf16.msra.mxu0 %v213_v5  ;;  %v222_v13 = vpack.c.bf16 %v62_v12, %v61_v11  ;;  %v225_v16 = vpack.c.bf16 %v64_v15, %v63_v14  ;;  %v65_v17 = vld [vmem:[#allocation5 + $0x50] sm:$0xff]  ;;  %v66_v18 = vld [vmem:[#allocation5 + $0x58] sm:$0xff]  ;;  %v67_v20 = vld [vmem:[#allocation5 + $0x60] sm:$0xff]  ;;  %p289_p2 = scmp.ne.s32.totalorder %s150_s12, %s288_s13  ;;  %p294_p4 = scmp.lt.s32.totalorder %s288_s13, %s288_s13 }
  0x2b   :  { %215 = vmatprep.subr.bf16.mxu0 %v320_v0  ;;  %v228_v19 = vpack.c.bf16 %v66_v18, %v65_v17  ;;  %v68_v21 = vld [vmem:[#allocation5 + $0x68] sm:$0xff]  ;;  %v69_v23 = vld [vmem:[#allocation5 + $0x70] sm:$0xff]  ;;  %v70_v24 = vld [vmem:[#allocation5 + $0x78] sm:$0xff] }
  0x2c   :  { %v231_v22 = vpack.c.bf16 %v68_v21, %v67_v20  ;;  %v234_v25 = vpack.c.bf16 %v70_v24, %v69_v23  ;;  %v54_v26 = vld [vmem:[#allocation2] sm:$0xff]  ;;  %p295_p5 = por %p294_p4, %p293_p3 }
  0x2d   :  { %v159_v27 = vld [vmem:[%s392_s2] ss:$0 sm:$0xff] }
  0x2e   :  { %217 = vmatpush3.bf16.msra.mxu0 %v216_v7  ;;  %p296_p6 = pnand %p295_p5, %p289_p2 }
  0x2f   :  { %218 = vmatprep.subr.bf16.mxu0 %v320_v0 }
  0x32   :  { %220 = vmatpush3.bf16.msra.mxu0 %v219_v10 }
  0x33   :  { %221 = vmatprep.subr.bf16.mxu0 %v320_v0 }
  0x36   :  { %223 = vmatpush3.bf16.msra.mxu0 %v222_v13 }
  0x37   :  { %224 = vmatprep.subr.bf16.mxu0 %v320_v0 }
  0x3a   :  { %226 = vmatpush3.bf16.msra.mxu0 %v225_v16 }
  0x3b   :  { %227 = vmatprep.subr.bf16.mxu0 %v320_v0 }
  0x3e   :  { %229 = vmatpush3.bf16.msra.mxu0 %v228_v19 }
  0x3f   :  { %230 = vmatprep.subr.bf16.mxu0 %v320_v0 }
  0x42   :  { %232 = vmatpush3.bf16.msra.mxu0 %v231_v22 }
  0x43   :  { %233 = vmatprep.subr.bf16.mxu0 %v320_v0 }
  0x46   :  { %235 = vmatpush3.bf16.msra.mxu0 %v234_v25 }
  0x49   :  { %210 = vmatmul.mubr.f32.vlgmr.msra.gmra.mrb[0].mxu0 %v54_v26 }
 0x11c   :  { %v137_v28 = vpop.f32.mrb[0].mxu0 }
 0x11d   :  { %v141_v29 = vadd.f32 %v159_v27, %v137_v28  ;;  %v211_v30 = vpop.f32.mrb[1].mxu0 }
 0x11f   :  { %142 = vst [vmem:[#allocation7] sm:$0xff] %v141_v29 }
 0x120   :  { %299 = shalt.err (!%p296_p6)
}
 0x121   :  { %s300_s16 = scalar_lea.hbm %s393_s3, 128 }
 0x122   :  { %p301_p7 = scmp.ne.s32.totalorder %s393_s3, %s300_s16  ;;  %p304_p8 = scmp.lt.u32.totalorder %s300_s16, %s393_s3 }
 0x124   :  { %p306_p9 = pnand %p304_p8, %p301_p7 }
 0x126   :  { %309 = shalt.err (!%p306_p9)
}
 0x127   :  { %152 = dma.vmem_to_hbm [thread:$0]  %s150_s12, 128, %s393_s3, [#allocation4]  }
 0x128   :  { %314 = dma.done.wait [#allocation4], 128  }
 0x129   :  { %315 = vsyncadd [#allocation4], 4294967168 }
 0x12a   :  { %156 = vsyncpa [#allocation3], 1 }
 0x12b   :  { %157 = vsyncpa [#allocation6], 1 }
 0x12c   :  { %158 = vsyncpa [#allocation4], 1 }

</bundles_post_ra>
